<compile_context>
chip_gen: v7x
topology: tpu7x:2x2x1
jax: 0.10.0
libtpu: 0.0.40
codegen_flags: <defaults>
</compile_context>

<pallas_src>
import math

import jax
import jax.numpy as jnp
from jax.experimental import pallas as pl
from jax.experimental.pallas import tpu as pltpu


def _round_up(v, m):
    return (v + m - 1) // m * m


def _node_encoder_kernel(idx_ref, tab_ref, out_ref):
    # idx_ref: [TM, 2] int32  (col 0: text id, col 1: type id + text_vocab)
    # tab_ref: [Vpad, OUT] f32 packed embedding table (text rows, then type
    #                          rows, then zero padding)
    # out_ref: [TM, OUT] f32  concatenated embeddings
    idx = idx_ref[...]
    vpad = tab_ref.shape[0]

    # Single-vreg lane iota; the compares broadcast it along sublanes, so we
    # never materialize a [TM, Vpad] iota.
    lanes = jax.lax.broadcasted_iota(jnp.int32, (1, vpad), 1)

    # Two-hot row selector.  OR of the two matches is exact because the text
    # range [0, text_vocab) and the shifted type range
    # [text_vocab, text_vocab + type_vocab) are disjoint in the packed vocab.
    two_hot = ((lanes == idx[:, 0:1]) | (lanes == idx[:, 1:2])).astype(jnp.float32)

    # One MXU matmul fuses both lookups and the concat (f32 -> exact).
    out_ref[...] = jnp.dot(two_hot, tab_ref[...],
                           preferred_element_type=jnp.float32)


def node_encoder_forward(x, text_table, type_table, *, tile_m=1024):
    """x: int array [..., 2]; returns [..., text_out + type_out] float32."""
    lead_shape = x.shape[:-1]
    n = math.prod(lead_shape) if lead_shape else 1
    idx = x.reshape(n, 2).astype(jnp.int32)

    text_vocab, text_out = text_table.shape
    type_vocab, type_out = type_table.shape
    out_dim = text_out + type_out

    # --- glue: pack both vocabularies into ONE lane-padded block ----------
    # (a single 128-lane block for the default 101 + 3 vocab sizes)
    vpad = _round_up(text_vocab + type_vocab, 128)
    packed_tab = jnp.zeros((vpad, out_dim), jnp.float32)
    packed_tab = packed_tab.at[:text_vocab, :text_out].set(
        text_table.astype(jnp.float32))
    packed_tab = packed_tab.at[text_vocab:text_vocab + type_vocab, text_out:].set(
        type_table.astype(jnp.float32))

    # Shift type indices to sit right after the text vocab (ranges stay
    # disjoint, which keeps the OR-based two-hot exact).
    idx_packed = jnp.stack([idx[:, 0], idx[:, 1] + text_vocab], axis=-1)

    # --- tile the row axis -------------------------------------------------
    # Large tiles (per-grid-step overhead ~0.35 us vs tiny per-row traffic),
    # but cap at ~half the padded rows so there are >=2 grid steps whenever
    # possible and the "parallel" axis can shard across both v7x TensorCores.
    n8 = _round_up(n, 8)
    half = _round_up((n8 + 1) // 2, 8)
    tm = max(8, min(tile_m, half))
    n_pad = _round_up(n, tm)
    if n_pad != n:
        idx_packed = jnp.pad(idx_packed, ((0, n_pad - n), (0, 0)))

    grid = (n_pad // tm,)

    out = pl.pallas_call(
        _node_encoder_kernel,
        out_shape=jax.ShapeDtypeStruct((n_pad, out_dim), jnp.float32),
        grid=grid,
        in_specs=[
            pl.BlockSpec((tm, 2), lambda i: (i, 0)),          # indices (tiled)
            pl.BlockSpec((vpad, out_dim), lambda i: (0, 0)),  # packed table
        ],
        out_specs=pl.BlockSpec((tm, out_dim), lambda i: (i, 0)),
        compiler_params=pltpu.CompilerParams(
            dimension_semantics=("parallel",)),
        cost_estimate=pl.CostEstimate(
            flops=2 * n_pad * vpad * out_dim,
            transcendentals=0,
            bytes_accessed=4 * (n_pad * 2 + vpad * out_dim + n_pad * out_dim)),
    )(idx_packed, packed_tab)

    return out[:n].reshape(*lead_shape, out_dim)


def _reference(x, text_table, type_table):
    text = text_table[x[..., 0]]
    type_ = type_table[x[..., 1]]
    return jnp.concatenate([text, type_], axis=-1)


if __name__ == "__main__":
    key = jax.random.PRNGKey(0)

    # NodeEncoder(text_in=100, text_out=32, type_in=3, type_out=32)
    text_in, text_out = 100, 32
    type_in, type_out = 3, 32
    text_vocab = text_in + 1

    k = jax.random.split(key, 4)
    text_table = jax.random.normal(k[0], (text_vocab, text_out), jnp.float32)
    type_table = jax.random.normal(k[1], (type_in, type_out), jnp.float32)

    # Node features: batch of 4 graphs x 16 nodes, each node = (text id, type id)
    batch, nodes = 4, 16
    text_ids = jax.random.randint(k[2], (batch, nodes), 0, text_vocab, jnp.int32)
    type_ids = jax.random.randint(k[3], (batch, nodes), 0, type_in, jnp.int32)
    x = jnp.stack([text_ids, type_ids], axis=-1)            # [4, 16, 2]

    out = node_encoder_forward(x, text_table, type_table)
    jax.block_until_ready(out)

    ref = _reference(x, text_table, type_table)
    assert out.shape == (batch, nodes, text_out + type_out)
    assert jnp.allclose(out, ref, atol=1e-6, rtol=1e-6)

    print("KERNEL_OK")
</pallas_src>

<mosaic_0001>
module attributes {stable_mosaic.version = 11 : i64} {
  func.func @_node_encoder_kernel(%arg0: i32, %arg1: memref<32x2xi32, #tpu.memory_space<vmem>>, %arg2: memref<128x64xf32, #tpu.memory_space<vmem>>, %arg3: memref<32x64xf32, #tpu.memory_space<vmem>>) attributes {dimension_semantics = [#tpu.dimension_semantics<parallel>], iteration_bounds = array<i64: 2>, scalar_prefetch = 0 : i64, scratch_operands = 0 : i64, tpu.core_type = #tpu.core_type<tc>, window_params = [{transform_indices = @transform_0, window_bounds = array<i64: 32, 2>}, {pipeline_mode = #tpu.pipeline_mode<synchronous>, transform_indices = @transform_1, window_bounds = array<i64: 128, 64>}, {transform_indices = @transform_2, window_bounds = array<i64: 32, 64>}]} {
    %c0 = arith.constant 0 : index
    %c0_0 = arith.constant 0 : index
    %0 = vector.load %arg1[%c0, %c0_0] : memref<32x2xi32, #tpu.memory_space<vmem>>, vector<32x2xi32>
    %1 = tpu.iota {dimensions = array<i32: 1>} : vector<1x128xi32>
    %2 = vector.extract_strided_slice %0 {offsets = [0, 0], sizes = [32, 1], strides = [1, 1]} : vector<32x2xi32> to vector<32x1xi32>
    %3 = vector.broadcast %1 : vector<1x128xi32> to vector<32x128xi32>
    %4 = vector.broadcast %2 : vector<32x1xi32> to vector<32x128xi32>
    %5 = arith.cmpi eq, %3, %4 : vector<32x128xi32>
    %6 = vector.extract_strided_slice %0 {offsets = [0, 1], sizes = [32, 1], strides = [1, 1]} : vector<32x2xi32> to vector<32x1xi32>
    %7 = vector.broadcast %1 : vector<1x128xi32> to vector<32x128xi32>
    %8 = vector.broadcast %6 : vector<32x1xi32> to vector<32x128xi32>
    %9 = arith.cmpi eq, %7, %8 : vector<32x128xi32>
    %10 = arith.ori %5, %9 : vector<32x128xi1>
    %11 = arith.extui %10 : vector<32x128xi1> to vector<32x128xi32>
    %12 = arith.sitofp %11 : vector<32x128xi32> to vector<32x128xf32>
    %c0_1 = arith.constant 0 : index
    %c0_2 = arith.constant 0 : index
    %13 = vector.load %arg2[%c0_1, %c0_2] : memref<128x64xf32, #tpu.memory_space<vmem>>, vector<128x64xf32>
    %cst = arith.constant dense<0.000000e+00> : vector<32x64xf32>
    %14 = tpu.matmul %12, %13, %cst {dimension_numbers = #tpu.dot_dimension_numbers<[1], [0], [0], [1], [0, 0, 1, 1], [], []>} : vector<32x128xf32>, vector<128x64xf32>, vector<32x64xf32> -> vector<32x64xf32>
    %c0_3 = arith.constant 0 : index
    %c0_4 = arith.constant 0 : index
    %15 = vector.load %arg3[%c0_3, %c0_4] : memref<32x64xf32, #tpu.memory_space<vmem>>, vector<32x64xf32>
    tpu.vector_store %arg3[%c0_3, %c0_4], %14 {strides = array<i32>} : memref<32x64xf32, #tpu.memory_space<vmem>>, vector<32x64xf32>,
    return
  }
  func.func @transform_0(%arg0: i32) -> (i32, i32) {
    %c0_i32 = arith.constant 0 : i32
    %c0_i32_0 = arith.constant 0 : i32
    return %arg0, %c0_i32 : i32, i32
  }
  func.func @transform_1(%arg0: i32) -> (i32, i32) {
    %c0_i32 = arith.constant 0 : i32
    %c0_i32_0 = arith.constant 0 : i32
    %c0_i32_1 = arith.constant 0 : i32
    return %c0_i32, %c0_i32_0 : i32, i32
  }
  func.func @transform_2(%arg0: i32) -> (i32, i32) {
    %c0_i32 = arith.constant 0 : i32
    %c0_i32_0 = arith.constant 0 : i32
    return %arg0, %c0_i32 : i32, i32
  }
}

</mosaic_0001>

<bundles_post_ra>
// kernel: tpu_custom_call.1
= control target key start
LH: loop header
LB: loop body
LE: loop exit
PB: predicated region body
PF: predicated region fallthrough
CT: control target
= control target key end

     0   :  { %7 = vsyncpa [#allocation3], 0  ;;  %s788_s0 = inlined_call_operand.vmem [shape: s32[64,2], index: 0, kind: input, shape index: {}]   ;;  %s789_s1 = inlined_call_operand.vmem [shape: f32[128,64], index: 1, kind: input, shape index: {}]   ;;  %s790_s2 = inlined_call_operand.hbm [shape: f32[64,64], index: 2, kind: output, shape index: {}]  }
   0x1   :  { %9 = vsyncpa [#allocation3 + $0x1], 0  ;;  %s638_s9 = smov 0   ;;  %s640_s10 = smov 0  }
   0x2   :  { %s642_s11 = smov 0   ;;  %s644_s12 = smov 0  }
   0x3 LB: > { %s659_s13 = sadd.s32 4294967295, %s615_s12   ;;  %s377_s14 = sadd.s32 4294967294, %s615_s12   ;;  %s615_s12 = sphi %s644_s12, %s796_s12   ;;  %s611_s11 = sphi %s642_s11, %s795_s11   ;;  %s607_s10 = sphi %s640_s10, %s794_s10   ;;  %s603_s9 = sphi %s638_s9, %s793_s9  }
   0x4   : > { %s663_s15 = sadd.s32 1, %s615_s12   ;;  %s69_s16 = sadd.s32 1, %s611_s11 }
   0x5   : > { %s66_s17 = ssub.s32 %s615_s12, %s663_s15  ;;  %p79_p0 = scmp.ne.s32.totalorder %s611_s11, %s607_s10 }
   0x6   : > { %p67_p1 = scmp.eq.s32.totalorder %s66_s17, 0  ;;  %p80_p2 = scmp.eq.s32.totalorder %s659_s13, 1 }
   0x7   : > { %p85_p3 = scmp.ne.s32.totalorder %s607_s10, %s603_s9  ;;  %p86_p4 = scmp.eq.s32.totalorder %s377_s14, 1 }
   0x8   : > { %s674_s18 = scalar_select %p67_p1, %s611_s11, %s69_s16  }
   0x9   : > { %p676_p5 = por %p80_p2, %p79_p0  ;;  %p680_p6 = por %p86_p4, %p85_p3 }
   0xa   : > { %p380_p7 = scmp.ge.s32.totalorder %s615_s12, 1  ;;  %p116_p8 = scmp.lt.s32.totalorder %s615_s12, 3 }
   0xc   : > { %p117_p9 = pnand %p380_p7, %p116_p8 }
   0xd   : > { %s382_s21 = sshll.u32 (!%p117_p9), %s659_s13, 2  ;;  %v195_v0 = vld [vmem:[%s789_s1] sm:$0xff] (!%p117_p9)  ;;  %v196_v1 = vld [vmem:[%s789_s1 + $0x8] sm:$0xff] (!%p117_p9)  ;;  %v197_v2 = vld [vmem:[%s789_s1 + $0x10] sm:$0xff] (!%p117_p9)  ;;  %v617_v3 = vmov (!%p117_p9), 1   ;;  %v618_v4 = vmov (!%p117_p9), 0   ;;  %v149_v30 = vlaneseq (!%p117_p9) }
   0xe   : > { %120 = sbr.rel (%p117_p9) target bundleno = 397 (0x18d), region = 28  ;;  %549 = vset.pattern.permute.xlu1 (!%p117_p9), %v617_v3  ;;  %548 = vset.pattern.permute.xlu0 (!%p117_p9), %v618_v4  ;;  %p139_p10 = scmp.lt.s32.totalorder (!%p117_p9), %s382_s21, 7  ;;  %v456_v5 = vpack.c.bf16 (!%p117_p9), %v196_v1, %v195_v0  ;;  %v198_v6 = vld [vmem:[%s789_s1 + $0x18] sm:$0xff] (!%p117_p9)  ;;  %v199_v8 = vld [vmem:[%s789_s1 + $0x20] sm:$0xff] (!%p117_p9)  ;;  %v200_v9 = vld [vmem:[%s789_s1 + $0x28] sm:$0xff] (!%p117_p9)  ;;  %v619_v34 = vmov (!%p117_p9), 1.0  }
   0xf   : > { %v460_v7 = vpack.c.bf16 (!%p117_p9), %v198_v6, %v197_v2  ;;  %v464_v10 = vpack.c.bf16 (!%p117_p9), %v200_v9, %v199_v8  ;;  %v201_v12 = vld [vmem:[%s789_s1 + $0x30] sm:$0xff] (!%p117_p9)  ;;  %v202_v13 = vld [vmem:[%s789_s1 + $0x38] sm:$0xff] (!%p117_p9)  ;;  %v203_v16 = vld [vmem:[%s789_s1 + $0x40] sm:$0xff] (!%p117_p9)  ;;  %v150_v31 = vand.u32 (!%p117_p9), 127, %v149_v30  ;;  %s135_s17 = sand.u32 (!%p117_p9), 1, %s607_s10   ;;  %s397_s24 = sshll.u32 (!%p117_p9), %s659_s13, 9 }
  0x10   : > { %457 = vmatprep.subr.bf16.mxu0 (!%p117_p9), %v456_v5  ;;  %488 = vmatprep.subr.bf16.mxu1 (!%p117_p9), %v456_v5  ;;  %v468_v15 = vpack.c.bf16 (!%p117_p9), %v202_v13, %v201_v12  ;;  %v204_v17 = vld [vmem:[%s789_s1 + $0x48] sm:$0xff] (!%p117_p9)  ;;  %v205_v21 = vld [vmem:[%s789_s1 + $0x50] sm:$0xff] (!%p117_p9)  ;;  %v206_v22 = vld [vmem:[%s789_s1 + $0x58] sm:$0xff] (!%p117_p9)  ;;  %s381_s22 = sshll.u32 (!%p117_p9), %s135_s17, 5  ;;  %vm296_vm12 = vcmask (!%p117_p9), 523264   ;;  %s745_s27 = scalar_lea.hbm (!%p117_p9), %s790_s2, %s397_s24 }
  0x11   : > { %459 = vmatpush3.bf16.msra.mxu0 (!%p117_p9), %v456_v5  ;;  %496 = vmatpush3.bf16.msra.mxu1 (!%p117_p9), %v456_v5  ;;  %v472_v20 = vpack.c.bf16 (!%p117_p9), %v204_v17, %v203_v16  ;;  %v476_v23 = vpack.c.bf16 (!%p117_p9), %v206_v22, %v205_v21  ;;  %v207_v24 = vld [vmem:[%s789_s1 + $0x60] sm:$0xff] (!%p117_p9)  ;;  %v208_v25 = vld [vmem:[%s789_s1 + $0x68] sm:$0xff] (!%p117_p9)  ;;  %v209_v27 = vld [vmem:[%s789_s1 + $0x70] sm:$0xff] (!%p117_p9)  ;;  %s137_s23 = scalar_lea.vmem (!%p117_p9), [#allocation2], %s381_s22  ;;  %s747_s13 = scalar_lea.sflag (!%p117_p9), [#allocation3], %s135_s17 }
  0x12   : > { %461 = vmatprep.subr.bf16.mxu0 (!%p117_p9), %v460_v7  ;;  %489 = vmatprep.subr.bf16.mxu1 (!%p117_p9), %v460_v7  ;;  %v480_v26 = vpack.c.bf16 (!%p117_p9), %v208_v25, %v207_v24  ;;  %v210_v28 = vld [vmem:[%s789_s1 + $0x78] sm:$0xff] (!%p117_p9)  ;;  %s620_s29 = smov (!%p117_p9), [#allocation2]  }
  0x13   : > { %v484_v29 = vpack.c.bf16 (!%p117_p9), %v210_v28, %v209_v27  ;;  %s557_s30 = sshll.u32 (!%p117_p9), %s620_s29, 4  ;;  %s558_s30 = int_to_ptr.vmem [resolvable:$false] %s557_s30 }
  0x14   : > { %s559_s3 = scalar_lea.vmem (!%p117_p9), %s558_s30, 1024 }
  0x15   : > { %s798_s21 = smov (!%p139_p10, %s382_s21), 7  ;;  %463 = vmatpush3.bf16.msra.mxu0 %v460_v7  ;;  %497 = vmatpush3.bf16.msra.mxu1 %v460_v7 }
  0x16   : > { %s383_s6 = sshll.u32 %s798_s21, 3  ;;  %465 = vmatprep.subr.bf16.mxu0 %v464_v10  ;;  %490 = vmatprep.subr.bf16.mxu1 %v464_v10  ;;  %s315_s21 = sshll.u32 %s137_s23, 4  ;;  %s740_s21 = int_to_ptr.vmem [resolvable:$true] %s315_s21 }
  0x17   : > { %s142_s14 = scalar_lea.vmem %s788_s0, %s383_s6  ;;  %s553_s28 = scalar_lea.vmem %s740_s21, 512 }
  0x18   : > { %v145_v11 = vld [vmem:[%s142_s14] sm:$0xff]  ;;  %v147_v14 = vld [vmem:[%s142_s14 + $0x10] sm:$0xff]  ;;  %v146_v18 = vld [vmem:[%s142_s14 + $0x8] sm:$0xff]  ;;  %p554_p11 = scmp.ne.s32.totalorder %s740_s21, %s553_s28  ;;  %p560_p0 = scmp.lt.s32.totalorder %s740_s21, %s558_s30 }
  0x19   : > { %168 = vperm.xlu1 %549, %v145_v11   ;;  %152 = vperm.xlu0 %548, %v145_v11   ;;  %v148_v19 = vld [vmem:[%s142_s14 + $0x18] sm:$0xff]  ;;  %p561_p1 = scmp.lt.s32.totalorder %s559_s3, %s553_s28 }
  0x1a   : > { %467 = vmatpush3.bf16.msra.mxu0 %v464_v10  ;;  %498 = vmatpush3.bf16.msra.mxu1 %v464_v10  ;;  %p555_p12 = pnand %p554_p11, %p676_p5 }
  0x1b   : > { %469 = vmatprep.subr.bf16.mxu0 %v468_v15  ;;  %491 = vmatprep.subr.bf16.mxu1 %v468_v15  ;;  %p562_p2 = por %p561_p1, %p560_p0 }
  0x1c   : > { %p556_p13 = pneg %p555_p12 }
  0x1d   : > { %174 = vperm.xlu1 %549, %v147_v14   ;;  %158 = vperm.xlu0 %548, %v147_v14  }
  0x1e   : > { %471 = vmatpush3.bf16.msra.mxu0 %v468_v15  ;;  %499 = vmatpush3.bf16.msra.mxu1 %v468_v15  ;;  %p563_p3 = pnand %p562_p2, %p556_p13 }
  0x1f   : > { %473 = vmatprep.subr.bf16.mxu0 %v472_v20  ;;  %492 = vmatprep.subr.bf16.mxu1 %v472_v20 }
  0x21   : > { %550 = vset.pattern.permute.xlu1 %v618_v4  ;;  %155 = vperm.xlu0 %548, %v146_v18  }
  0x22   : > { %161 = vperm.xlu1 %550, %v148_v19   ;;  %475 = vmatpush3.bf16.msra.mxu0 %v472_v20 }
  0x23   : > { %500 = vmatpush3.bf16.msra.mxu1 %v472_v20  ;;  %477 = vmatprep.subr.bf16.mxu0 %v476_v23 }
  0x24   : > { %493 = vmatprep.subr.bf16.mxu1 %v476_v23 }
  0x25   : > { %551 = vset.pattern.permute.xlu0 %v617_v3 }
  0x26   : > { %552 = vset.pattern.permute.xlu1 %v617_v3  ;;  %171 = vperm.xlu0 %551, %v146_v18  }
  0x27   : > { %177 = vperm.xlu1 %552, %v148_v19   ;;  %479 = vmatpush3.bf16.msra.mxu0 %v476_v23 }
  0x28   : > { %501 = vmatpush3.bf16.msra.mxu1 %v476_v23  ;;  %481 = vmatprep.subr.bf16.mxu0 %v480_v26 }
  0x29   : > { %494 = vmatprep.subr.bf16.mxu1 %v480_v26 }
  0x2b   : > { %483 = vmatpush3.bf16.msra.mxu0 %v480_v26 }
  0x2c   : > { %502 = vmatpush3.bf16.msra.mxu1 %v480_v26  ;;  %485 = vmatprep.subr.bf16.mxu0 %v484_v29 }
  0x2d   : > { %495 = vmatprep.subr.bf16.mxu1 %v484_v29 }
  0x2f   : > { %487 = vmatpush3.bf16.msra.mxu0 %v484_v29 }
  0x30   : > { %503 = vmatpush3.bf16.msra.mxu1 %v484_v29 }
  0x98   : > { %v169_v32 = vpop.permute.xlu1 %168  ;;  %v153_v33 = vpop.permute.xlu0 %152 }
  0x99   : > { %vm179_vm0 = vcmp.eq.s32.totalorder %v150_v31, %v169_v32  ;;  %vm163_vm1 = vcmp.eq.s32.totalorder %v150_v31, %v153_v33 }
  0x9a   : > { %vm183_vm2 = vmor %vm163_vm1, %vm179_vm0 }
  0x9b   : > { %450 = vmatprep.mubr.msk.f32.mxu0 %vm183_vm2, %v619_v34 }
  0x9c   : > { %v175_v35 = vpop.permute.xlu1 %174  ;;  %v159_v36 = vpop.permute.xlu0 %158 }
  0x9d   : > { %vm181_vm3 = vcmp.eq.s32.totalorder %v150_v31, %v175_v35  ;;  %vm165_vm4 = vcmp.eq.s32.totalorder %v150_v31, %v159_v36 }
  0x9e   : > { %vm185_vm5 = vmor %vm165_vm4, %vm181_vm3 }
  0x9f   : > { %453 = vmatprep.mubr.msk.f32.mxu1 %vm185_vm5, %v619_v34 }
  0xa0   : > { %v156_v37 = vpop.permute.xlu0 %155 }
  0xa1   : > { %v162_v38 = vpop.permute.xlu1 %161  ;;  %vm164_vm6 = vcmp.eq.s32.totalorder %v150_v31, %v156_v37 }
  0xa2   : > { %vm166_vm8 = vcmp.eq.s32.totalorder %v150_v31, %v162_v38 }
  0xa5   : > { %v172_v39 = vpop.permute.xlu0 %171 }
  0xa6   : > { %vm180_vm7 = vcmp.eq.s32.totalorder %v150_v31, %v172_v39  ;;  %v178_v40 = vpop.permute.xlu1 %177 }
  0xa7   : > { %vm184_vm9 = vmor %vm164_vm6, %vm180_vm7  ;;  %vm182_vm10 = vcmp.eq.s32.totalorder %v150_v31, %v178_v40 }
  0xa8   : > { %vm186_vm11 = vmor %vm166_vm8, %vm182_vm10  ;;  %451 = vmatmul.mubr.msk.f32.vlgmr.msra.gmra.mrb[0].mxu0 %vm184_vm9, %v619_v34 }
  0xa9   : > { %454 = vmatmul.mubr.msk.f32.vlgmr.msra.gmra.mrb[0].mxu1 %vm186_vm11, %v619_v34 }
 0x17b   : > { %v452_v41 = vpop.f32.mrb[0].mxu0 }
 0x17c   : > { %298 = vst.msk [vmem:[%s137_s23 + $0x8] sm:$0xff] %vm296_vm12, %v452_v41  ;;  %v277_v42 = vpop.f32.mrb[1].mxu0  ;;  %v455_v43 = vpop.f32.mrb[0].mxu1 }
 0x17d   : > { %297 = vst.msk [vmem:[%s137_s23] sm:$0xff] %vm296_vm12, %v277_v42  ;;  %300 = vst.msk [vmem:[%s137_s23 + $0x18] sm:$0xff] %vm296_vm12, %v455_v43  ;;  %v287_v44 = vpop.f32.mrb[1].mxu1 }
 0x17e   : > { %299 = vst.msk [vmem:[%s137_s23 + $0x10] sm:$0xff] %vm296_vm12, %v287_v44 }
 0x17f   : > { %566 = shalt.err (!%p563_p3)
}
 0x180   : > { %s567_s4 = scalar_lea.hbm %s745_s27, 512  ;;  %s571_s7 = scalar_lea.hbm %s790_s2, 1024 }
 0x181   : > { %p568_p4 = scmp.ne.s32.totalorder %s745_s27, %s567_s4  ;;  %p572_p9 = scmp.lt.u32.totalorder %s745_s27, %s790_s2 }
 0x182   : > { %p573_p10 = scmp.lt.u32.totalorder %s571_s7, %s567_s4  ;;  %p575_p12 = scmp.lt.u32.totalorder %s567_s4, %s745_s27 }
 0x183   : > { %p569_p7 = pnand %p568_p4, %p676_p5 }
 0x184   : > { %p574_p11 = por %p573_p10, %p572_p9 }
 0x185   : > { %p570_p8 = pneg %p569_p7 }
 0x186   : > { %p576_p13 = por %p575_p12, %p574_p11 }
 0x188   : > { %p577_p0 = pnand %p576_p13, %p570_p8 }
 0x18a   : > { %580 = shalt.err (!%p577_p0)
}
 0x18b   : > { %s621_s16 = smov 128   ;;  %s622_s17 = smov 8  }
 0x18c   : > { %504 = dma.vmem_to_hbm [thread:$0]  (%p676_p5), %s740_s21, 512, %s745_s27, %s747_s13, %s621_s16, %s621_s16, %s622_s17  }
 0x18d PF: > { %p510_p1 = scmp.ge.s32.totalorder %s615_s12, 2  ;;  %s330_s22 = sand.u32 1, %s603_s9  }
 0x18e   : > { %s331_s23 = scalar_lea.sflag [#allocation3], %s330_s22 }
 0x18f   : > { %p507_p2 = pnand %p510_p1, %p680_p6 }
 0x191   : > { %598 = dma.done.wait (!%p507_p2), %s331_s23, 512  }
 0x192   : > { %600 = vsyncadd (!%p507_p2), %s331_s23, 4294966784  ;;  %p12_p3 = scmp.ge.s32.totalorder %s663_s15, 4   ;;  %s793_s9 = smov %s607_s10 }
 0x193   : > { %s794_s10 = smov %s611_s11  ;;  %s795_s11 = smov %s674_s18 }
 0x194   : > { %s796_s12 = smov %s663_s15  ;;  %14 = sbr.rel (!%p12_p3) target bundleno = 3 (0x3), region = 63 }
 0x19b   :  { %336 = vsyncpa [#allocation3], 1 }
 0x19c   :  { %338 = vsyncpa [#allocation3 + $0x1], 1 }

</bundles_post_ra>
